<compile_context>
chip_gen: v6e
topology: v6e:2x2x1
jax: 0.10.0
libtpu: 0.0.40
codegen_flags: <defaults>
</compile_context>

<pallas_src>
import functools

import jax
import jax.numpy as jnp
from jax.experimental import pallas as pl
from jax.experimental.pallas import tpu as pltpu


_F32_BLOCK_CAP_BYTES = 4 * 1024 * 1024   # padded-f32 footprint cap for one input block
_VMEM_LIMIT_BYTES = 32 * 1024 * 1024     # raises v5e's 16 MiB default, safe on v7x


def _softpool_kernel(dec_ref, out_ref, m_sc, num_sc, den_sc, *,
                     inv_t, classes, groups, ts, s_valid, mask_tail):
    """Online softmax-weighted sum over the pooled axis.

    dec_ref : (tb, ts, C_l) input block, C_l = groups * classes
    out_ref : (tb, classes) output block (written on the last pooled step)
    m/num/den_sc : (tb, C_l) f32 running max / weighted sum / normalizer
    """
    s_idx = pl.program_id(1)

    @pl.when(s_idx == 0)
    def _init():
        m_sc[...] = jnp.full_like(m_sc, -jnp.inf)
        num_sc[...] = jnp.zeros_like(num_sc)
        den_sc[...] = jnp.zeros_like(den_sc)

    d = dec_ref[...].astype(jnp.float32)                 # (tb, ts, C_l)
    z = d if inv_t == 1.0 else d * inv_t                 # d / T (T is static)

    if mask_tail:
        # The last pooled-axis block reads past S_k; those rows hold garbage.
        # Mask them out of the max (z -> -inf) and the sums (d -> 0 so a
        # garbage NaN/Inf cannot leak through d * e).
        row = jax.lax.broadcasted_iota(jnp.int32, d.shape, 1)
        valid = (s_idx * ts + row) < s_valid
        z = jnp.where(valid, z, -jnp.inf)
        d = jnp.where(valid, d, 0.0)

    m_prev = m_sc[...]
    m_new = jnp.maximum(m_prev, jnp.max(z, axis=1))      # (tb, C_l)
    alpha = jnp.exp(m_prev - m_new)                      # rescales old accumulators
    e = jnp.exp(z - m_new[:, None, :])                   # (tb, ts, C_l) -> EUP
    num_sc[...] = alpha * num_sc[...] + jnp.sum(d * e, axis=1)
    den_sc[...] = alpha * den_sc[...] + jnp.sum(e, axis=1)
    m_sc[...] = m_new

    @pl.when(s_idx == pl.num_programs(1) - 1)
    def _finalize():
        m, num, den = m_sc[...], num_sc[...], den_sc[...]
        if groups > 1:
            # Merge the `groups` lane groups: each holds an independent
            # partial softmax over a disjoint subset of the pooled axis.
            # Tiny (tb, classes) tiles -> negligible vs. the streamed input.
            C = classes
            m_g = [m[:, j * C:(j + 1) * C] for j in range(groups)]
            n_g = [num[:, j * C:(j + 1) * C] for j in range(groups)]
            d_g = [den[:, j * C:(j + 1) * C] for j in range(groups)]
            m_all = m_g[0]
            for j in range(1, groups):
                m_all = jnp.maximum(m_all, m_g[j])
            num = jnp.zeros_like(m_all)
            den = jnp.zeros_like(m_all)
            for j in range(groups):
                a = jnp.exp(m_g[j] - m_all)
                num = num + a * n_g[j]
                den = den + a * d_g[j]
        # EUP-seeded reciprocal + one Newton step (~f32 accurate; den in (0, S]).
        r = pl.reciprocal(den, approx=True)
        r = r * (2.0 - den * r)
        out_ref[...] = (num * r).astype(out_ref.dtype)


def _round_batch_block(tb, B):
    # (8, 128) rule on the (tb, C) output block: a partial batch block must be
    # a multiple of 8 (or equal the full batch).  When B % tb != 0 the padded
    # tail rows of the last block compute on garbage, but rows are independent
    # and Pallas masks out-of-range output writes, so results stay correct.
    tb = max(1, min(int(tb), B))
    if tb >= B:
        return B
    tb = (tb // 8) * 8
    return min(max(tb, 8), B)


def _round_pool_block(ts, S_k):
    # Sublane rule on the (tb, ts, C_l) input block: ts must be a multiple of
    # 8 or equal the full pooled extent.
    ts = max(1, min(int(ts), S_k))
    if ts >= S_k:
        return S_k
    ts = (ts // 8) * 8
    return min(max(ts, 8), S_k)


def _pick_blocks(B, S_k, C_l):
    """Pick (batch rows, pooled rows) per grid step.

    The cap is on the *padded* (sublane x lane) f32 footprint of one block
    (~4 MiB).  That keeps the per-step HBM DMA in the multi-MiB range (>= the
    ~1 MiB knee of the measured roofline sweep) while double-buffered inputs
    + f32 temporaries (~5-6x the block) stay well inside the 32 MiB scoped
    VMEM limit on v5e/v6e/v7x.
    """
    max_elems = _F32_BLOCK_CAP_BYTES // 4
    c_pad = -(-C_l // 128) * 128                     # lane padding
    row_elems = (-(-S_k // 8) * 8) * c_pad           # padded elems of one (S_k, C_l) row
    min_tb = B if B < 8 else 8
    if min_tb * row_elems <= max_elems:
        # Whole pooled axis per step; take as many batch rows as fit the cap.
        tb = min(B, max_elems // row_elems)
        if tb < B:
            tb = (tb // 8) * 8
        return tb, S_k
    # Even the minimum-size batch block over the full pooled axis would blow
    # the budget: tile the pooled axis (online accumulation in the kernel).
    tb = min_tb
    ts = min(S_k, max(8, (max_elems // (tb * c_pad)) // 8 * 8))
    return tb, ts


def softpool(logits, decision, T=1.0, pooldim=1, block_b=None, block_s=None):
    """Pallas implementation of SoftPool.forward(logits, decision).

    decision: (B, S, C) float array (f32 or bf16); returns (B, C) in the same
    dtype.  `logits` is unused, mirroring the reference PyTorch module.  T is
    a compile-time constant (module hyper-parameter).  `block_b` / `block_s`
    override the block-size heuristic (testing / tuning only).
    """
    del logits  # unused in the reference forward
    if pooldim != 1:
        raise NotImplementedError("kernel assumes pooldim=1 with (B, S, C) input")
    decision = jnp.asarray(decision)
    if decision.ndim != 3:
        raise NotImplementedError("kernel expects a rank-3 (B, S, C) decision tensor")
    inv_t = 1.0 / float(T)
    B, S, C = decision.shape

    # Lane folding: fold `group` pooled steps into the lane axis when C < 128
    # (free row-major reshape; innermost dims stay contiguous).
    group = 1
    if C < 128 and S > 1:
        for g in range(min(S, 128 // C), 1, -1):
            if S % g == 0:
                group = g
                break
    dec_k = decision.reshape(B, S // group, group * C) if group > 1 else decision
    S_k, C_l = dec_k.shape[1], dec_k.shape[2]

    tb, ts = _pick_blocks(B, S_k, C_l)
    if block_b is not None:
        tb = block_b
    if block_s is not None:
        ts = block_s
    tb = _round_batch_block(tb, B)
    ts = _round_pool_block(ts, S_k)
    mask_tail = (S_k % ts) != 0
    grid = (pl.cdiv(B, tb), pl.cdiv(S_k, ts))

    itemsize = jnp.dtype(decision.dtype).itemsize
    cost = pl.CostEstimate(
        flops=7 * B * S * C,
        transcendentals=B * S * C,
        bytes_accessed=(B * S * C + B * C) * itemsize,
    )

    kernel = functools.partial(
        _softpool_kernel, inv_t=inv_t, classes=C, groups=group,
        ts=ts, s_valid=S_k, mask_tail=mask_tail)

    return pl.pallas_call(
        kernel,
        out_shape=jax.ShapeDtypeStruct((B, C), decision.dtype),
        grid_spec=pltpu.PrefetchScalarGridSpec(
            num_scalar_prefetch=0,
            grid=grid,
            in_specs=[pl.BlockSpec((tb, ts, C_l), lambda b, s: (b, s, 0))],
            out_specs=pl.BlockSpec((tb, C), lambda b, s: (b, 0)),
            scratch_shapes=[pltpu.VMEM((tb, C_l), jnp.float32)] * 3,
        ),
        compiler_params=pltpu.CompilerParams(
            # Batch axis shards across TensorCores (2 TCs on v7x); the pooled
            # reduction axis is the trailing "arbitrary" axis.
            dimension_semantics=("parallel", "arbitrary"),
            # Explicit limit: raises v5e's 16 MiB default and stays inside
            # v7x's 64 MiB physical VMEM.
            vmem_limit_bytes=_VMEM_LIMIT_BYTES,
        ),
        cost_estimate=cost,
    )(dec_k)


def softpool_ref(decision, T=1.0, pooldim=1):
    z = decision / T
    z = z - jnp.max(z, axis=pooldim, keepdims=True)
    e = jnp.exp(z)
    w = e / jnp.sum(e, axis=pooldim, keepdims=True)
    return jnp.sum(decision * w, axis=pooldim)


if __name__ == "__main__":
    key = jax.random.PRNGKey(0)
    k1, k2, k3, k4 = jax.random.split(key, 4)

    # 1) Small shape matching the module's (N, T, C) usage; exercises the
    #    lane-folding path (C=32 -> 4 pooled steps folded into 128 lanes).
    B, S, C = 2, 8, 32
    logits = jax.random.normal(k1, (B, S, C), dtype=jnp.float32)   # unused by forward
    decision = jax.random.normal(k2, (B, S, C), dtype=jnp.float32)
    out = jax.block_until_ready(softpool(logits, decision, T=1.0, pooldim=1))
    ref = softpool_ref(decision, T=1.0, pooldim=1)
    assert out.shape == (B, C), out.shape
    assert jnp.allclose(out, ref, atol=1e-5, rtol=1e-5), (
        f"max err {jnp.max(jnp.abs(out - ref))}")

    # 2) Non-unit T, ragged batch (B % tb != 0), pooled-axis tiling with a
    #    masked tail (forced small blocks), partial lane fold (g=2, C_l=64).
    B2, S2, C2 = 13, 50, 32
    decision2 = jax.random.normal(k3, (B2, S2, C2), dtype=jnp.float32)
    out2 = jax.block_until_ready(
        softpool(None, decision2, T=2.0, pooldim=1, block_b=8, block_s=8))
    ref2 = softpool_ref(decision2, T=2.0, pooldim=1)
    assert out2.shape == (B2, C2), out2.shape
    assert jnp.allclose(out2, ref2, atol=1e-5, rtol=1e-5), (
        f"max err {jnp.max(jnp.abs(out2 - ref2))}")

    # 3) C >= 128: no lane folding, plain streaming-reduction path.
    B3, S3, C3 = 4, 16, 160
    decision3 = jax.random.normal(k4, (B3, S3, C3), dtype=jnp.float32)
    out3 = jax.block_until_ready(softpool(None, decision3, T=1.0, pooldim=1))
    ref3 = softpool_ref(decision3, T=1.0, pooldim=1)
    assert out3.shape == (B3, C3), out3.shape
    assert jnp.allclose(out3, ref3, atol=1e-5, rtol=1e-5), (
        f"max err {jnp.max(jnp.abs(out3 - ref3))}")

    print("KERNEL_OK")
</pallas_src>

<mosaic_0001>
module attributes {stable_mosaic.version = 11 : i64} {
  func.func @_softpool_kernel(%arg0: i32, %arg1: i32, %arg2: memref<2x2x128xf32, #tpu.memory_space<vmem>>, %arg3: memref<2x32xf32, #tpu.memory_space<vmem>>, %arg4: memref<2x128xf32, #tpu.memory_space<vmem>>, %arg5: memref<2x128xf32, #tpu.memory_space<vmem>>, %arg6: memref<2x128xf32, #tpu.memory_space<vmem>>) attributes {dimension_semantics = [#tpu.dimension_semantics<parallel>, #tpu.dimension_semantics<arbitrary>], iteration_bounds = array<i64: 1, 1>, scalar_prefetch = 0 : i64, scratch_operands = 3 : i64, tpu.core_type = #tpu.core_type<tc>, window_params = [{transform_indices = @transform_0, window_bounds = array<i64: 2, 2, 128>}, {transform_indices = @transform_1, window_bounds = array<i64: 2, 32>}]} {
    %c0_i32 = arith.constant 0 : i32
    %0 = arith.cmpi eq, %arg1, %c0_i32 : i32
    %1 = arith.extui %0 : i1 to i32
    %c0_i32_0 = arith.constant 0 : i32
    %2 = arith.cmpi ne, %1, %c0_i32_0 : i32
    scf.if %2 {
      %cst_19 = arith.constant 0xFF800000 : f32
      %28 = vector.broadcast %cst_19 : f32 to vector<2x128xf32>
      %c0_20 = arith.constant 0 : index
      %c0_21 = arith.constant 0 : index
      %29 = vector.load %arg4[%c0_20, %c0_21] : memref<2x128xf32, #tpu.memory_space<vmem>>, vector<2x128xf32>
      tpu.vector_store %arg4[%c0_20, %c0_21], %28 {strides = array<i32>} : memref<2x128xf32, #tpu.memory_space<vmem>>, vector<2x128xf32>,
      %cst_22 = arith.constant 0.000000e+00 : f32
      %30 = vector.broadcast %cst_22 : f32 to vector<2x128xf32>
      %c0_23 = arith.constant 0 : index
      %c0_24 = arith.constant 0 : index
      %31 = vector.load %arg5[%c0_23, %c0_24] : memref<2x128xf32, #tpu.memory_space<vmem>>, vector<2x128xf32>
      tpu.vector_store %arg5[%c0_23, %c0_24], %30 {strides = array<i32>} : memref<2x128xf32, #tpu.memory_space<vmem>>, vector<2x128xf32>,
      %cst_25 = arith.constant 0.000000e+00 : f32
      %32 = vector.broadcast %cst_25 : f32 to vector<2x128xf32>
      %c0_26 = arith.constant 0 : index
      %c0_27 = arith.constant 0 : index
      %33 = vector.load %arg6[%c0_26, %c0_27] : memref<2x128xf32, #tpu.memory_space<vmem>>, vector<2x128xf32>
      tpu.vector_store %arg6[%c0_26, %c0_27], %32 {strides = array<i32>} : memref<2x128xf32, #tpu.memory_space<vmem>>, vector<2x128xf32>,
    } else {
    }
    %c0 = arith.constant 0 : index
    %c0_1 = arith.constant 0 : index
    %c0_2 = arith.constant 0 : index
    %3 = vector.load %arg2[%c0, %c0_1, %c0_2] : memref<2x2x128xf32, #tpu.memory_space<vmem>>, vector<2x2x128xf32>
    %c0_3 = arith.constant 0 : index
    %c0_4 = arith.constant 0 : index
    %4 = vector.load %arg4[%c0_3, %c0_4] : memref<2x128xf32, #tpu.memory_space<vmem>>, vector<2x128xf32>
    %cst = arith.constant dense<0xFF800000> : vector<2x128xf32>
    %5 = vector.multi_reduction <maximumf>, %3, %cst [1] : vector<2x2x128xf32> to vector<2x128xf32>
    %6 = arith.maximumf %4, %5 : vector<2x128xf32>
    %7 = arith.subf %4, %6 : vector<2x128xf32>
    %8 = math.exp %7 : vector<2x128xf32>
    %9 = vector.shape_cast %6 : vector<2x128xf32> to vector<2x1x128xf32>
    %10 = vector.broadcast %9 : vector<2x1x128xf32> to vector<2x2x128xf32>
    %11 = arith.subf %3, %10 : vector<2x2x128xf32>
    %12 = math.exp %11 : vector<2x2x128xf32>
    %c0_5 = arith.constant 0 : index
    %c0_6 = arith.constant 0 : index
    %13 = vector.load %arg5[%c0_5, %c0_6] : memref<2x128xf32, #tpu.memory_space<vmem>>, vector<2x128xf32>
    %14 = arith.mulf %8, %13 : vector<2x128xf32>
    %15 = arith.mulf %3, %12 : vector<2x2x128xf32>
    %cst_7 = arith.constant dense<0.000000e+00> : vector<2x128xf32>
    %16 = vector.multi_reduction <add>, %15, %cst_7 [1] : vector<2x2x128xf32> to vector<2x128xf32>
    %17 = arith.addf %14, %16 : vector<2x128xf32>
    %c0_8 = arith.constant 0 : index
    %c0_9 = arith.constant 0 : index
    %18 = vector.load %arg5[%c0_8, %c0_9] : memref<2x128xf32, #tpu.memory_space<vmem>>, vector<2x128xf32>
    tpu.vector_store %arg5[%c0_8, %c0_9], %17 {strides = array<i32>} : memref<2x128xf32, #tpu.memory_space<vmem>>, vector<2x128xf32>,
    %c0_10 = arith.constant 0 : index
    %c0_11 = arith.constant 0 : index
    %19 = vector.load %arg6[%c0_10, %c0_11] : memref<2x128xf32, #tpu.memory_space<vmem>>, vector<2x128xf32>
    %20 = arith.mulf %8, %19 : vector<2x128xf32>
    %cst_12 = arith.constant dense<0.000000e+00> : vector<2x128xf32>
    %21 = vector.multi_reduction <add>, %12, %cst_12 [1] : vector<2x2x128xf32> to vector<2x128xf32>
    %22 = arith.addf %20, %21 : vector<2x128xf32>
    %c0_13 = arith.constant 0 : index
    %c0_14 = arith.constant 0 : index
    %23 = vector.load %arg6[%c0_13, %c0_14] : memref<2x128xf32, #tpu.memory_space<vmem>>, vector<2x128xf32>
    tpu.vector_store %arg6[%c0_13, %c0_14], %22 {strides = array<i32>} : memref<2x128xf32, #tpu.memory_space<vmem>>, vector<2x128xf32>,
    %c0_15 = arith.constant 0 : index
    %c0_16 = arith.constant 0 : index
    %24 = vector.load %arg4[%c0_15, %c0_16] : memref<2x128xf32, #tpu.memory_space<vmem>>, vector<2x128xf32>
    tpu.vector_store %arg4[%c0_15, %c0_16], %6 {strides = array<i32>} : memref<2x128xf32, #tpu.memory_space<vmem>>, vector<2x128xf32>,
    %c0_i32_17 = arith.constant 0 : i32
    %25 = arith.cmpi eq, %arg1, %c0_i32_17 : i32
    %26 = arith.extui %25 : i1 to i32
    %c0_i32_18 = arith.constant 0 : i32
    %27 = arith.cmpi ne, %26, %c0_i32_18 : i32
    scf.if %27 {
      %c0_19 = arith.constant 0 : index
      %c0_20 = arith.constant 0 : index
      %28 = vector.load %arg4[%c0_19, %c0_20] : memref<2x128xf32, #tpu.memory_space<vmem>>, vector<2x128xf32>
      %c0_21 = arith.constant 0 : index
      %c0_22 = arith.constant 0 : index
      %29 = vector.load %arg5[%c0_21, %c0_22] : memref<2x128xf32, #tpu.memory_space<vmem>>, vector<2x128xf32>
      %c0_23 = arith.constant 0 : index
      %c0_24 = arith.constant 0 : index
      %30 = vector.load %arg6[%c0_23, %c0_24] : memref<2x128xf32, #tpu.memory_space<vmem>>, vector<2x128xf32>
      %31 = vector.extract_strided_slice %28 {offsets = [0, 0], sizes = [2, 32], strides = [1, 1]} : vector<2x128xf32> to vector<2x32xf32>
      %32 = vector.extract_strided_slice %28 {offsets = [0, 32], sizes = [2, 32], strides = [1, 1]} : vector<2x128xf32> to vector<2x32xf32>
      %33 = vector.extract_strided_slice %28 {offsets = [0, 64], sizes = [2, 32], strides = [1, 1]} : vector<2x128xf32> to vector<2x32xf32>
      %34 = vector.extract_strided_slice %28 {offsets = [0, 96], sizes = [2, 32], strides = [1, 1]} : vector<2x128xf32> to vector<2x32xf32>
      %35 = vector.extract_strided_slice %29 {offsets = [0, 0], sizes = [2, 32], strides = [1, 1]} : vector<2x128xf32> to vector<2x32xf32>
      %36 = vector.extract_strided_slice %29 {offsets = [0, 32], sizes = [2, 32], strides = [1, 1]} : vector<2x128xf32> to vector<2x32xf32>
      %37 = vector.extract_strided_slice %29 {offsets = [0, 64], sizes = [2, 32], strides = [1, 1]} : vector<2x128xf32> to vector<2x32xf32>
      %38 = vector.extract_strided_slice %29 {offsets = [0, 96], sizes = [2, 32], strides = [1, 1]} : vector<2x128xf32> to vector<2x32xf32>
      %39 = vector.extract_strided_slice %30 {offsets = [0, 0], sizes = [2, 32], strides = [1, 1]} : vector<2x128xf32> to vector<2x32xf32>
      %40 = vector.extract_strided_slice %30 {offsets = [0, 32], sizes = [2, 32], strides = [1, 1]} : vector<2x128xf32> to vector<2x32xf32>
      %41 = vector.extract_strided_slice %30 {offsets = [0, 64], sizes = [2, 32], strides = [1, 1]} : vector<2x128xf32> to vector<2x32xf32>
      %42 = vector.extract_strided_slice %30 {offsets = [0, 96], sizes = [2, 32], strides = [1, 1]} : vector<2x128xf32> to vector<2x32xf32>
      %43 = arith.maximumf %31, %32 : vector<2x32xf32>
      %44 = arith.maximumf %43, %33 : vector<2x32xf32>
      %45 = arith.maximumf %44, %34 : vector<2x32xf32>
      %cst_25 = arith.constant 0.000000e+00 : f32
      %46 = vector.broadcast %cst_25 : f32 to vector<2x32xf32>
      %cst_26 = arith.constant 0.000000e+00 : f32
      %47 = vector.broadcast %cst_26 : f32 to vector<2x32xf32>
      %48 = arith.subf %31, %45 : vector<2x32xf32>
      %49 = math.exp %48 : vector<2x32xf32>
      %50 = arith.mulf %49, %35 : vector<2x32xf32>
      %51 = arith.addf %46, %50 : vector<2x32xf32>
      %52 = arith.mulf %49, %39 : vector<2x32xf32>
      %53 = arith.addf %47, %52 : vector<2x32xf32>
      %54 = arith.subf %32, %45 : vector<2x32xf32>
      %55 = math.exp %54 : vector<2x32xf32>
      %56 = arith.mulf %55, %36 : vector<2x32xf32>
      %57 = arith.addf %51, %56 : vector<2x32xf32>
      %58 = arith.mulf %55, %40 : vector<2x32xf32>
      %59 = arith.addf %53, %58 : vector<2x32xf32>
      %60 = arith.subf %33, %45 : vector<2x32xf32>
      %61 = math.exp %60 : vector<2x32xf32>
      %62 = arith.mulf %61, %37 : vector<2x32xf32>
      %63 = arith.addf %57, %62 : vector<2x32xf32>
      %64 = arith.mulf %61, %41 : vector<2x32xf32>
      %65 = arith.addf %59, %64 : vector<2x32xf32>
      %66 = arith.subf %34, %45 : vector<2x32xf32>
      %67 = math.exp %66 : vector<2x32xf32>
      %68 = arith.mulf %67, %38 : vector<2x32xf32>
      %69 = arith.addf %63, %68 : vector<2x32xf32>
      %70 = arith.mulf %67, %42 : vector<2x32xf32>
      %71 = arith.addf %65, %70 : vector<2x32xf32>
      %72 = tpu.reciprocal %71 {approx = true} : vector<2x32xf32> -> vector<2x32xf32>
      %73 = arith.mulf %71, %72 : vector<2x32xf32>
      %cst_27 = arith.constant 2.000000e+00 : f32
      %74 = vector.broadcast %cst_27 : f32 to vector<2x32xf32>
      %75 = arith.subf %74, %73 : vector<2x32xf32>
      %76 = arith.mulf %72, %75 : vector<2x32xf32>
      %77 = arith.mulf %69, %76 : vector<2x32xf32>
      %c0_28 = arith.constant 0 : index
      %c0_29 = arith.constant 0 : index
      %78 = vector.load %arg3[%c0_28, %c0_29] : memref<2x32xf32, #tpu.memory_space<vmem>>, vector<2x32xf32>
      tpu.vector_store %arg3[%c0_28, %c0_29], %77 {strides = array<i32>} : memref<2x32xf32, #tpu.memory_space<vmem>>, vector<2x32xf32>,
    } else {
    }
    return
  }
  func.func @transform_0(%arg0: i32, %arg1: i32) -> (i32, i32, i32) {
    %c0_i32 = arith.constant 0 : i32
    %c0_i32_0 = arith.constant 0 : i32
    return %arg0, %arg1, %c0_i32 : i32, i32, i32
  }
  func.func @transform_1(%arg0: i32, %arg1: i32) -> (i32, i32) {
    %c0_i32 = arith.constant 0 : i32
    %c0_i32_0 = arith.constant 0 : i32
    return %arg0, %c0_i32 : i32, i32
  }
}

</mosaic_0001>

<bundles_post_ra>
// kernel: tpu_custom_call.1
= control target key start
LH: loop header
LB: loop body
LE: loop exit
PB: predicated region body
PF: predicated region fallthrough
CT: control target
= control target key end

     0   :  { %6 = vsyncpa [#allocation6], 0  ;;  %s373_s0 = inlined_call_operand.hbm [shape: f32[2,2,128], index: 0, kind: input, shape index: {}]   ;;  %s374_s1 = inlined_call_operand.hbm [shape: f32[2,32], index: 1, kind: output, shape index: {}]  }
   0x1   :  { %7 = vsyncpa [#allocation7], 0  ;;  %s315_s6 = smov [#allocation5]  }
   0x2   :  { %s13_s7 = sshll.u32 %s315_s6, 4  ;;  %s14_s7 = int_to_ptr.vmem [resolvable:$true] %s13_s7 }
   0x3   :  { %s279_s8 = scalar_lea.vmem %s14_s7, 64  ;;  %p284_p1 = scmp.lt.s32.totalorder %s14_s7, %s14_s7 }
   0x4   :  { %p280_p0 = scmp.ne.s32.totalorder %s14_s7, %s279_s8  ;;  %p285_p2 = scmp.lt.s32.totalorder %s279_s8, %s279_s8 }
   0x6   :  { %p286_p3 = por %p285_p2, %p284_p1 }
   0x8   :  { %p287_p4 = pnand %p286_p3, %p280_p0 }
   0xa   :  { %290 = shalt.err (!%p287_p4)
}
   0xb   :  { %s316_s9 = smov 32   ;;  %s317_s10 = smov 2  }
   0xc   :  { %19 = dma.hbm_to_vmem [thread:$0]  %s373_s0, 64, %s14_s7, [#allocation6], %s316_s9, %s316_s9, %s317_s10  }
   0xd   :  { %311 = dma.done.wait [#allocation6], 64  }
   0xe   :  { %312 = vsyncadd [#allocation6], 4294967232  ;;  %v318_v0 = vmov -inf   ;;  %vm33_vm0 = vcmask 1041408   ;;  %v30_v1 = vld [vmem:[#allocation5] sm:$0x3]  ;;  %v61_v11 = vlaneseq }
   0xf   :  { %27 = vst [vmem:[#allocation2] sm:$0x3] %v318_v0  ;;  %v31_v2 = vld [vmem:[#allocation5 + $0x2] sm:$0x3]  ;;  %v34_v3 = vsel %vm33_vm0, %v30_v1, -inf  ;;  %vm50_vm1 = vcmask 1041409  }
  0x10   :  { %v41_v4 = vsel %vm33_vm0, %v31_v2, -inf  ;;  %v35_v5 = vrot.slane %v34_v3, 4  ;;  %v319_v9 = vmov 1966171168   ;;  %v62_v17 = vshrl.u32 %v61_v11, 7  ;;  %s321_s0 = smov 96  }
  0x11   :  { %v42_v6 = vrot.slane %v41_v4, 4  ;;  %v59_v10 = vunpack.c.l.s4 %v319_v9  ;;  %v320_v30 = vmov 0.0   ;;  %s322_s13 = smov 64   ;;  %s323_s14 = smov [#allocation8]   ;;  %vm229_vm2 = vcmask 254976  }
  0x12   :  { %v36_v7 = vmax.f32 %v34_v3, %v35_v5  ;;  %v82_v26 = vsub.s32 0, %v62_v17  ;;  %29 = vst [vmem:[#allocation4] sm:$0x3] %v320_v30  ;;  %28 = vst [vmem:[#allocation3] sm:$0x3] %v320_v30  ;;  %s237_s15 = sshll.u32 %s323_s14, 4  ;;  %s238_s15 = int_to_ptr.vmem [resolvable:$true] %s237_s15 }
  0x13   :  { %v43_v8 = vmax.f32 %v41_v4, %v42_v6  ;;  %v60_v16 = vunpack.c.0.s8 %v59_v10  ;;  %s291_s16 = scalar_lea.vmem %s238_s15, 32  ;;  %p296_p6 = scmp.lt.s32.totalorder %s238_s15, %s238_s15 }
  0x14   :  { %v37_v12 = vrot.slane %v36_v7, 2  ;;  %p292_p5 = scmp.ne.s32.totalorder %s238_s15, %s291_s16  ;;  %p297_p7 = scmp.lt.s32.totalorder %s291_s16, %s291_s16 }
  0x15   :  { %v44_v13 = vrot.slane %v43_v8, 2  ;;  %v63_v23 = vsub.s32 %v60_v16, %v62_v17 }
  0x16   :  { %v38_v14 = vmax.f32 %v36_v7, %v37_v12  ;;  %v32_v20 = vld [vmem:[#allocation2] sm:$0x3]  ;;  %p298_p8 = por %p297_p7, %p296_p6 }
  0x17   :  { %v45_v15 = vmax.f32 %v43_v8, %v44_v13 }
  0x18   :  { %v39_v18 = vrot.slane %v38_v14, 1  ;;  %p299_p9 = pnand %p298_p8, %p292_p5 }
  0x19   :  { %v46_v19 = vrot.slane %v45_v15, 1  ;;  %v120_v62 = vld [vmem:[#allocation4] sm:$0x3]  ;;  %v96_v5 = vld [vmem:[#allocation3] sm:$0x3] }
  0x1a   :  { %v40_v21 = vmax.f32 %v38_v14, %v39_v18 }
  0x1b   :  { %v47_v22 = vmax.f32 %v45_v15, %v46_v19 }
  0x1d   :  { %v51_v24 = vsel %vm50_vm1, %v47_v22, %v40_v21 }
  0x1e   :  { %v53_v25 = vmax.f32 %v32_v20, %v51_v24 }
  0x20   :  { %142 = vst [vmem:[#allocation2] sm:$0x3] %v53_v25  ;;  %v64_v27 = vrot.slane %v53_v25, %v63_v23  ;;  %v54_v39 = vsub.f32 %v32_v20, %v53_v25 }
  0x22   :  { %v65_v28 = vcombine.high %v64_v27, %v64_v27  ;;  %v72_v29 = vrot.slane %v64_v27, %v63_v23  ;;  %v55_v40 = vmul.f32 1.442695, %v54_v39 }
  0x24   :  { %v79_v31 = vrot.slane %v65_v28, %v63_v23  ;;  %v83_v32 = vrot.slane %v72_v29, %v82_v26 }
  0x26   :  { %v87_v33 = vrot.slane %v79_v31, %v82_v26  ;;  %v90_v34 = vsub.f32 %v30_v1, %v83_v32 }
  0x27   :  { %v342_v35 = vld [vmem:[#allocation2] sm:$0x3] }
  0x28   :  { %150 = vrot.lane.b32.xlu0 %v342_v35, %s321_s0  ;;  %v91_v36 = vsub.f32 %v31_v2, %v87_v33  ;;  %v92_v37 = vmul.f32 1.442695, %v90_v34  ;;  %158 = vrot.lane.b32.xlu1 %v342_v35, %s316_s9 }
  0x2a   :  { %255 = vpow2.f32 %v92_v37  ;;  %v94_v38 = vmul.f32 1.442695, %v91_v36 }
  0x2c   :  { %257 = vpow2.f32 %v94_v38  ;;  %154 = vrot.lane.b32.xlu0 %v342_v35, %s322_s13 }
  0x2d   :  { %259 = vpow2.f32 %v55_v40 }
  0x37   :  { %v256_v41 = vpop.eup %255 }
  0x38   :  { %v122_v42 = vsel %vm33_vm0, %v256_v41, 0.0  ;;  %v98_v43 = vmul.f32 %v256_v41, %v30_v1 }
  0x39   :  { %v258_v44 = vpop.eup %257  ;;  %v123_v45 = vrot.slane %v122_v42, 4 }
  0x3a   :  { %v129_v46 = vsel %vm33_vm0, %v258_v44, 0.0  ;;  %v99_v47 = vmul.f32 %v258_v44, %v31_v2  ;;  %v100_v48 = vsel %vm33_vm0, %v98_v43, 0.0  ;;  %v260_v61 = vpop.eup %259 }
  0x3b   :  { %v124_v49 = vadd.f32 %v123_v45, %v122_v42  ;;  %v130_v50 = vrot.slane %v129_v46, 4  ;;  %v101_v51 = vrot.slane %v100_v48, 4  ;;  %v121_v8 = vmul.f32 %v260_v61, %v120_v62 }
  0x3c   :  { %v107_v52 = vsel %vm33_vm0, %v99_v47, 0.0  ;;  %v97_v12 = vmul.f32 %v260_v61, %v96_v5 }
  0x3d   :  { %v125_v53 = vrot.slane %v124_v49, 2  ;;  %v131_v54 = vadd.f32 %v130_v50, %v129_v46  ;;  %v102_v55 = vadd.f32 %v101_v51, %v100_v48  ;;  %v108_v56 = vrot.slane %v107_v52, 4 }
  0x3f   :  { %v126_v57 = vadd.f32 %v125_v53, %v124_v49  ;;  %v132_v58 = vrot.slane %v131_v54, 2  ;;  %v103_v59 = vrot.slane %v102_v55, 2  ;;  %v109_v60 = vadd.f32 %v108_v56, %v107_v52 }
  0x41   :  { %v127_v63 = vrot.slane %v126_v57, 1  ;;  %v133_v0 = vadd.f32 %v132_v58, %v131_v54  ;;  %v104_v1 = vadd.f32 %v103_v59, %v102_v55  ;;  %v110_v2 = vrot.slane %v109_v60, 2 }
  0x43   :  { %v128_v3 = vadd.f32 %v127_v63, %v126_v57  ;;  %v134_v4 = vrot.slane %v133_v0, 1  ;;  %v105_v6 = vrot.slane %v104_v1, 1  ;;  %v111_v7 = vadd.f32 %v110_v2, %v109_v60 }
  0x45   :  { %v135_v9 = vadd.f32 %v134_v4, %v133_v0  ;;  %v106_v10 = vadd.f32 %v105_v6, %v104_v1  ;;  %v112_v11 = vrot.slane %v111_v7, 1 }
  0x47   :  { %v138_v13 = vsel %vm50_vm1, %v135_v9, %v128_v3  ;;  %v113_v14 = vadd.f32 %v112_v11, %v111_v7 }
  0x48   :  { %v140_v15 = vadd.f32 %v138_v13, %v121_v8 }
  0x49   :  { %v116_v16 = vsel %vm50_vm1, %v113_v14, %v106_v10 }
  0x4a   :  { %141 = vst [vmem:[#allocation4] sm:$0x3] %v140_v15  ;;  %v118_v17 = vadd.f32 %v116_v16, %v97_v12 }
  0x4c   :  { %119 = vst [vmem:[#allocation3] sm:$0x3] %v118_v17 }
  0x51   :  { %v148_v34 = vld [vmem:[#allocation4] sm:$0x3] }
  0x53   :  { %v147_v40 = vld [vmem:[#allocation3] sm:$0x3] }
  0x9a   :  { %v151_v18 = vpop.permute.xlu0 %150  ;;  %v159_v21 = vpop.permute.xlu1 %158 }
  0x9b   :  { %v153_v19 = vmax.f32 %v342_v35, %v151_v18 }
  0x9e   :  { %v155_v20 = vpop.permute.xlu0 %154 }
  0x9f   :  { %v157_v22 = vmax.f32 %v153_v19, %v155_v20 }
  0xa1   :  { %v161_v23 = vmax.f32 %v157_v22, %v159_v21 }
  0xa3   :  { %188 = vrot.lane.b32.xlu0 %v161_v23, %s322_s13  ;;  %170 = vrot.lane.b32.xlu1 %v161_v23, %s316_s9  ;;  %v162_v45 = vsub.f32 %v342_v35, %v161_v23 }
  0xa5   :  { %v163_v46 = vmul.f32 1.442695, %v162_v45 }
  0xa7   :  { %206 = vrot.lane.b32.xlu1 %v161_v23, %s321_s0 }
 0x115   :  { %v189_v24 = vpop.permute.xlu0 %188  ;;  %v171_v25 = vpop.permute.xlu1 %170 }
 0x116   :  { %v191_v26 = vsub.f32 %v342_v35, %v189_v24  ;;  %v173_v27 = vsub.f32 %v342_v35, %v171_v25 }
 0x118   :  { %v192_v28 = vmul.f32 1.442695, %v191_v26  ;;  %v174_v29 = vmul.f32 1.442695, %v173_v27 }
 0x119   :  { %v207_v30 = vpop.permute.xlu1 %206 }
 0x11a   :  { %261 = vpow2.f32 %v192_v28  ;;  %v209_v31 = vsub.f32 %v342_v35, %v207_v30 }
 0x11b   :  { %263 = vpow2.f32 %v174_v29 }
 0x11c   :  { %v210_v32 = vmul.f32 1.442695, %v209_v31 }
 0x11e   :  { %265 = vpow2.f32 %v210_v32 }
 0x11f   :  { %267 = vpow2.f32 %v163_v46 }
 0x127   :  { %v262_v33 = vpop.eup %261 }
 0x128   :  { %v264_v36 = vpop.eup %263  ;;  %v200_v37 = vmul.f32 %v262_v33, %v148_v34  ;;  %v194_v44 = vmul.f32 %v262_v33, %v147_v40 }
 0x129   :  { %v182_v38 = vmul.f32 %v264_v36, %v148_v34  ;;  %v176_v42 = vmul.f32 %v264_v36, %v147_v40 }
 0x12a   :  { %202 = vrot.lane.b32.xlu1 %v200_v37, %s322_s13 }
 0x12b   :  { %v266_v39 = vpop.eup %265  ;;  %184 = vrot.lane.b32.xlu0 %v182_v38, %s321_s0 }
 0x12c   :  { %v218_v41 = vmul.f32 %v266_v39, %v148_v34  ;;  %v212_v43 = vmul.f32 %v266_v39, %v147_v40  ;;  %v268_v47 = vpop.eup %267 }
 0x12d   :  { %v167_v48 = vmul.f32 %v268_v47, %v148_v34  ;;  %v165_v56 = vmul.f32 %v268_v47, %v147_v40 }
 0x12e   :  { %178 = vrot.lane.b32.xlu1 %v176_v42, %s321_s0 }
 0x12f   :  { %220 = vrot.lane.b32.xlu0 %v218_v41, %s316_s9 }
 0x132   :  { %214 = vrot.lane.b32.xlu1 %v212_v43, %s316_s9 }
 0x133   :  { %196 = vrot.lane.b32.xlu0 %v194_v44, %s322_s13 }
 0x19c   :  { %v203_v51 = vpop.permute.xlu1 %202 }
 0x19d   :  { %v185_v49 = vpop.permute.xlu0 %184 }
 0x19e   :  { %v187_v50 = vadd.f32 %v185_v49, %v167_v48 }
 0x1a0   :  { %v205_v52 = vadd.f32 %v203_v51, %v187_v50  ;;  %v179_v55 = vpop.permute.xlu1 %178 }
 0x1a1   :  { %v221_v53 = vpop.permute.xlu0 %220  ;;  %v181_v58 = vadd.f32 %v179_v55, %v165_v56 }
 0x1a2   :  { %v223_v54 = vadd.f32 %v221_v53, %v205_v52 }
 0x1a4   :  { %269 = vrcp.f32 %v223_v54  ;;  %v215_v35 = vpop.permute.xlu1 %214 }
 0x1a5   :  { %v197_v57 = vpop.permute.xlu0 %196 }
 0x1a6   :  { %v199_v61 = vadd.f32 %v197_v57, %v181_v58 }
 0x1a8   :  { %v217_v0 = vadd.f32 %v215_v35, %v199_v61 }
 0x1b1   :  { %v270_v59 = vpop.eup %269 }
 0x1b2   :  { %v225_v60 = vmul.f32 %v270_v59, %v223_v54 }
 0x1b4   :  { %v226_v62 = vsub.f32 2.0, %v225_v60 }
 0x1b6   :  { %v227_v63 = vmul.f32 %v270_v59, %v226_v62 }
 0x1b8   :  { %v228_v1 = vmul.f32 %v227_v63, %v217_v0 }
 0x1ba   :  { %230 = vst.msk [vmem:[#allocation8] sm:$0x3] %vm229_vm2, %v228_v1 }
 0x1bb   :  { %302 = shalt.err (!%p299_p9)
}
 0x1bc   :  { %240 = dma.vmem_to_hbm [thread:$0]  %s238_s15, 32, %s374_s1, [#allocation7]  }
 0x1bd   :  { %313 = dma.done.wait [#allocation7], 32  }
 0x1be   :  { %314 = vsyncadd [#allocation7], 4294967264 }
 0x1bf   :  { %244 = vsyncpa [#allocation6], 1 }
 0x1c0   :  { %245 = vsyncpa [#allocation7], 1 }

</bundles_post_ra>
